<compile_context>
chip_gen: v7x
topology: tpu7x:2x2x1
jax: 0.10.0
libtpu: 0.0.40
codegen_flags: <defaults>
</compile_context>

<pallas_src>
import jax
import jax.numpy as jnp
from jax.experimental import pallas as pl
from jax.experimental.pallas import tpu as pltpu

STATE_SIZE = 22
ACTION_SIZE = 6
FCS1_UNITS = 400
FC2_UNITS = 300
FC3_UNITS = 200
LN_EPS = 1e-5

SA_SIZE = STATE_SIZE + ACTION_SIZE   # 28 : fc1 matmul K (state ++ action)
F1P = 512                            # fc2 input width, lane-padded (>= 406)


def _round_up(x, m):
    return (x + m - 1) // m * m


def _pick_tile(b):
    """Batch tile selection (see header): small batch -> one tile; large batch
    -> >=2 grid steps with tiles up to 1024 rows (multiple of 128)."""
    if b <= 256:
        return _round_up(max(b, 1), 8)
    half = _round_up((b + 1) // 2, 128)
    return min(1024, half)


def _fused_layernorm(x, gamma, beta, n_feat):
    """PyTorch-style LayerNorm (biased var, eps inside sqrt), one-pass stats."""
    inv_n = 1.0 / float(n_feat)
    mu = jnp.sum(x, axis=-1, keepdims=True) * inv_n
    var = jnp.maximum(jnp.sum(x * x, axis=-1, keepdims=True) * inv_n - mu * mu, 0.0)
    return (x - mu) * jax.lax.rsqrt(var + LN_EPS) * gamma + beta


def critic_kernel(sa_ref, w1_ref, p1_ref, w2_ref, p2_ref, w3_ref, p34_ref,
                  b4_ref, out_ref):
    bf = jnp.bfloat16
    sa = sa_ref[...].astype(bf)                                     # (tb, 28)

    # ---- fc1, output lane-padded to F1P columns.  Cols [0,400): fcs1 units;
    # cols [400,406): raw action (identity rows of w1, zero bias); rest 0. ----
    pre = jnp.dot(sa, w1_ref[...], preferred_element_type=jnp.float32) + p1_ref[0:1, :]
    col = jax.lax.broadcasted_iota(jnp.int32, pre.shape, 1)
    is_feat = col < FCS1_UNITS
    m = jnp.where(is_feat, pre, 0.0)                                # mask action/pad cols out of LN stats
    inv_n = 1.0 / float(FCS1_UNITS)
    mu = jnp.sum(m, axis=-1, keepdims=True) * inv_n
    var = jnp.maximum(jnp.sum(m * m, axis=-1, keepdims=True) * inv_n - mu * mu, 0.0)
    xs_n = (m - mu) * jax.lax.rsqrt(var + LN_EPS) * p1_ref[1:2, :] + p1_ref[2:3, :]
    is_act = jnp.logical_and(col >= FCS1_UNITS, col < FCS1_UNITS + ACTION_SIZE)
    # concat(relu(LN1(xs)), action): relu output is exactly 0 on all padded
    # columns (gamma/beta pads are 0); action columns pass through raw.
    # TODO(synk): training-mode dropout (p=0.2) omitted; eval mode => identity.
    xa = jnp.where(is_act, pre, jnp.maximum(xs_n, 0.0)).astype(bf)  # bf16 activation storage

    # ---- fc2 -> LN2 -> ReLU : single K=512 matmul (no separate action matmul) ----
    x = jnp.dot(xa, w2_ref[...], preferred_element_type=jnp.float32) + p2_ref[0:1, :]
    x = jnp.maximum(_fused_layernorm(x, p2_ref[1:2, :], p2_ref[2:3, :], FC2_UNITS), 0.0)
    x = x.astype(bf)

    # ---- fc3 -> LN3 -> ReLU ----
    x = jnp.dot(x, w3_ref[...], preferred_element_type=jnp.float32) + p34_ref[0:1, :]
    x = jnp.maximum(_fused_layernorm(x, p34_ref[1:2, :], p34_ref[2:3, :], FC3_UNITS), 0.0)

    # ---- fc4 head (N=1): VPU multiply + lane reduce; lane-dense store ----
    q = jnp.sum(x * p34_ref[3:4, :], axis=-1) + b4_ref[0]           # (tb,)
    out_ref[...] = q.reshape(1, 1, q.shape[0])


@jax.jit
def enhanced_critic_forward(state, action, params):
    """state: (B, STATE_SIZE), action: (B, ACTION_SIZE) -> (B, 1) f32."""
    b = state.shape[0]
    tb = _pick_tile(b)
    bp = _round_up(b, tb)
    nt = bp // tb

    sa = jnp.concatenate([state, action], axis=-1)                  # (B, 28)
    if bp != b:
        sa = jnp.pad(sa, ((0, bp - b), (0, 0)))

    weights = (params["w1"], params["p1"], params["w2"], params["p2"],
               params["w3"], params["p34"])

    in_specs = (
        [pl.BlockSpec((tb, SA_SIZE), lambda i: (i, 0))]
        + [pl.BlockSpec(w.shape, lambda i: (0, 0)) for w in weights]   # VMEM-resident
        + [pl.BlockSpec(memory_space=pltpu.MemorySpace.SMEM)]          # b4 scalar
    )

    flops = 2 * bp * (SA_SIZE * F1P + F1P * FC2_UNITS + FC2_UNITS * FC3_UNITS + FC3_UNITS)
    weight_bytes = sum(int(w.size) * w.dtype.itemsize for w in weights) + 4
    bytes_accessed = bp * (SA_SIZE + 1) * 4 + weight_bytes

    out = pl.pallas_call(
        critic_kernel,
        out_shape=jax.ShapeDtypeStruct((nt, 1, tb), jnp.float32),
        grid=(nt,),
        in_specs=in_specs,
        out_specs=pl.BlockSpec((1, 1, tb), lambda i: (i, 0, 0)),
        compiler_params=pltpu.CompilerParams(
            dimension_semantics=("parallel",),        # v7x: batch split over 2 TCs
            vmem_limit_bytes=32 << 20,
        ),
        cost_estimate=pl.CostEstimate(
            flops=flops, transcendentals=3 * bp, bytes_accessed=bytes_accessed),
    )(sa, *weights, params["b4"])

    return out.reshape(bp)[:b].reshape(b, 1)


def init_params(seed=0):
    """Deterministic init mirroring the module shapes/fanin_init bounds.

    Packed layout (documented bf16-weight inference choice):
      w1  (28, 512) bf16 : [state rows -> fcs1 weights | action rows -> identity into cols 400..405]
      p1  (3, 512)  f32  : [b1 | gamma1 | beta1], zero in padded columns
      w2  (512,300) bf16 : rows 0..399 = W2[state part], rows 400..405 = W2[action part], rest 0
      p2  (3, 300)  f32  : [b2 | gamma2 | beta2]
      w3  (300,200) bf16
      p34 (4, 200)  f32  : [b3 | gamma3 | beta3 | w4 row]
      b4  (1,)      f32  (SMEM scalar)
    """
    key = jax.random.PRNGKey(seed)
    ks = jax.random.split(key, 8)

    def uni(k, shape, bound):
        return jax.random.uniform(k, shape, jnp.float32, -bound, bound)

    bnd1 = 1.0 / (FCS1_UNITS ** 0.5)
    bnd2 = 1.0 / (FC2_UNITS ** 0.5)
    bnd3 = 1.0 / (FC3_UNITS ** 0.5)
    bf = jnp.bfloat16

    w1 = jnp.zeros((SA_SIZE, F1P), jnp.float32)
    w1 = w1.at[:STATE_SIZE, :FCS1_UNITS].set(uni(ks[0], (STATE_SIZE, FCS1_UNITS), bnd1))
    w1 = w1.at[STATE_SIZE:, FCS1_UNITS:FCS1_UNITS + ACTION_SIZE].set(jnp.eye(ACTION_SIZE))

    p1 = jnp.zeros((3, F1P), jnp.float32)
    p1 = p1.at[0, :FCS1_UNITS].set(uni(ks[1], (FCS1_UNITS,), bnd1))
    p1 = p1.at[1, :FCS1_UNITS].set(1.0)

    w2_full = uni(ks[2], (FCS1_UNITS + ACTION_SIZE, FC2_UNITS), bnd2)
    w2 = jnp.zeros((F1P, FC2_UNITS), jnp.float32)
    w2 = w2.at[:FCS1_UNITS + ACTION_SIZE, :].set(w2_full)
    p2 = jnp.zeros((3, FC2_UNITS), jnp.float32)
    p2 = p2.at[0].set(uni(ks[3], (FC2_UNITS,), bnd2)).at[1].set(1.0)

    w3 = uni(ks[4], (FC2_UNITS, FC3_UNITS), bnd3)
    p34 = jnp.zeros((4, FC3_UNITS), jnp.float32)
    p34 = p34.at[0].set(uni(ks[5], (FC3_UNITS,), bnd3)).at[1].set(1.0)
    p34 = p34.at[3].set(uni(ks[6], (FC3_UNITS,), 3e-4))

    return {
        "w1": w1.astype(bf), "p1": p1,
        "w2": w2.astype(bf), "p2": p2,
        "w3": w3.astype(bf), "p34": p34,
        "b4": uni(ks[7], (1,), 3e-4),
    }


def _unpack(p):
    w1 = p["w1"][:STATE_SIZE, :FCS1_UNITS]
    b1, g1, be1 = (p["p1"][i, :FCS1_UNITS] for i in range(3))
    w2s = p["w2"][:FCS1_UNITS, :]
    w2a = p["w2"][FCS1_UNITS:FCS1_UNITS + ACTION_SIZE, :]
    b2, g2, be2 = p["p2"][0], p["p2"][1], p["p2"][2]
    w3 = p["w3"]
    b3, g3, be3, w4 = p["p34"][0], p["p34"][1], p["p34"][2], p["p34"][3]
    return w1, b1, g1, be1, w2s, w2a, b2, g2, be2, w3, b3, g3, be3, w4, p["b4"][0]


def reference_forward_mirror(state, action, p):
    """Pure-JAX reference mirroring the kernel math (bf16 matmuls, 1-pass LN)."""
    w1, b1, g1, be1, w2s, w2a, b2, g2, be2, w3, b3, g3, be3, w4, b4 = _unpack(p)
    bf = jnp.bfloat16

    def ln(x, g, be, n):
        inv_n = 1.0 / float(n)
        mu = jnp.sum(x, -1, keepdims=True) * inv_n
        var = jnp.maximum(jnp.sum(x * x, -1, keepdims=True) * inv_n - mu * mu, 0.0)
        return (x - mu) * jax.lax.rsqrt(var + LN_EPS) * g + be

    xs = jnp.dot(state.astype(bf), w1, preferred_element_type=jnp.float32) + b1
    xs = jnp.maximum(ln(xs, g1, be1, FCS1_UNITS), 0.0)
    x = (jnp.dot(xs.astype(bf), w2s, preferred_element_type=jnp.float32)
         + jnp.dot(action.astype(bf), w2a, preferred_element_type=jnp.float32) + b2)
    x = jnp.maximum(ln(x, g2, be2, FC2_UNITS), 0.0)
    x = jnp.dot(x.astype(bf), w3, preferred_element_type=jnp.float32) + b3
    x = jnp.maximum(ln(x, g3, be3, FC3_UNITS), 0.0)
    return jnp.sum(x * w4, axis=-1, keepdims=True) + b4


def reference_forward_f32(state, action, p):
    """Full-f32 reference with PyTorch-style two-pass LayerNorm (semantics check)."""
    w1, b1, g1, be1, w2s, w2a, b2, g2, be2, w3, b3, g3, be3, w4, b4 = _unpack(p)
    f32 = jnp.float32

    def ln(x, g, be):
        mu = jnp.mean(x, -1, keepdims=True)
        var = jnp.mean((x - mu) ** 2, -1, keepdims=True)
        return (x - mu) / jnp.sqrt(var + LN_EPS) * g + be

    xs = jnp.maximum(ln(state @ w1.astype(f32) + b1, g1, be1), 0.0)
    x = jnp.maximum(ln(xs @ w2s.astype(f32) + action @ w2a.astype(f32) + b2, g2, be2), 0.0)
    x = jnp.maximum(ln(x @ w3.astype(f32) + b3, g3, be3), 0.0)
    return jnp.sum(x * w4, axis=-1, keepdims=True) + b4


if __name__ == "__main__":
    params = init_params(seed=0)

    # Small canonical run (batch=2, single-tile path).
    ks, ka = jax.random.split(jax.random.PRNGKey(0))
    batch = 2
    state = jax.random.normal(ks, (batch, STATE_SIZE), jnp.float32)
    action = jax.random.normal(ka, (batch, ACTION_SIZE), jnp.float32)

    q = enhanced_critic_forward(state, action, params)
    jax.block_until_ready(q)
    assert q.shape == (batch, 1)

    q_mirror = reference_forward_mirror(state, action, params)
    q_f32 = reference_forward_f32(state, action, params)
    assert jnp.allclose(q, q_mirror, atol=1e-4, rtol=1e-3), (q, q_mirror)
    assert jnp.allclose(q, q_f32, atol=1.5e-3, rtol=0.1), (q, q_f32)

    # Larger run: multi-tile grid (>=2 steps) + batch padding path.
    kb_s, kb_a = jax.random.split(jax.random.PRNGKey(1))
    big = 600
    state_b = jax.random.normal(kb_s, (big, STATE_SIZE), jnp.float32)
    action_b = jax.random.normal(kb_a, (big, ACTION_SIZE), jnp.float32)
    qb = enhanced_critic_forward(state_b, action_b, params)
    jax.block_until_ready(qb)
    assert qb.shape == (big, 1)
    qb_mirror = reference_forward_mirror(state_b, action_b, params)
    assert jnp.allclose(qb, qb_mirror, atol=1e-4, rtol=1e-3)

    print("KERNEL_OK")
</pallas_src>

<mosaic_0001>
module attributes {stable_mosaic.version = 11 : i64} {
  func.func @critic_kernel(%arg0: i32, %arg1: memref<8x28xf32, #tpu.memory_space<vmem>>, %arg2: memref<28x512xbf16, #tpu.memory_space<vmem>>, %arg3: memref<3x512xf32, #tpu.memory_space<vmem>>, %arg4: memref<512x300xbf16, #tpu.memory_space<vmem>>, %arg5: memref<3x300xf32, #tpu.memory_space<vmem>>, %arg6: memref<300x200xbf16, #tpu.memory_space<vmem>>, %arg7: memref<4x200xf32, #tpu.memory_space<vmem>>, %arg8: memref<1xf32, #tpu.memory_space<smem>>, %arg9: memref<1x1x8xf32, #tpu.memory_space<vmem>>) attributes {dimension_semantics = [#tpu.dimension_semantics<parallel>], iteration_bounds = array<i64: 1>, scalar_prefetch = 0 : i64, scratch_operands = 0 : i64, tpu.core_type = #tpu.core_type<tc>, window_params = [{transform_indices = @transform_0, window_bounds = array<i64: 8, 28>}, {pipeline_mode = #tpu.pipeline_mode<synchronous>, transform_indices = @transform_1, window_bounds = array<i64: 28, 512>}, {pipeline_mode = #tpu.pipeline_mode<synchronous>, transform_indices = @transform_2, window_bounds = array<i64: 3, 512>}, {pipeline_mode = #tpu.pipeline_mode<synchronous>, transform_indices = @transform_3, window_bounds = array<i64: 512, 300>}, {pipeline_mode = #tpu.pipeline_mode<synchronous>, transform_indices = @transform_4, window_bounds = array<i64: 3, 300>}, {pipeline_mode = #tpu.pipeline_mode<synchronous>, transform_indices = @transform_5, window_bounds = array<i64: 300, 200>}, {pipeline_mode = #tpu.pipeline_mode<synchronous>, transform_indices = @transform_6, window_bounds = array<i64: 4, 200>}, {transform_indices = @transform_7, window_bounds = array<i64: 1>}, {transform_indices = @transform_8, window_bounds = array<i64: 1, 1, 8>}]} {
    %c0 = arith.constant 0 : index
    %c0_0 = arith.constant 0 : index
    %0 = vector.load %arg1[%c0, %c0_0] : memref<8x28xf32, #tpu.memory_space<vmem>>, vector<8x28xf32>
    %1 = arith.truncf %0 : vector<8x28xf32> to vector<8x28xbf16>
    %c0_1 = arith.constant 0 : index
    %c0_2 = arith.constant 0 : index
    %2 = vector.load %arg2[%c0_1, %c0_2] : memref<28x512xbf16, #tpu.memory_space<vmem>>, vector<28x512xbf16>
    %cst = arith.constant dense<0.000000e+00> : vector<8x512xf32>
    %3 = tpu.matmul %1, %2, %cst {dimension_numbers = #tpu.dot_dimension_numbers<[1], [0], [0], [1], [0, 0, 1, 1], [], []>} : vector<8x28xbf16>, vector<28x512xbf16>, vector<8x512xf32> -> vector<8x512xf32>
    %c0_3 = arith.constant 0 : index
    %c0_4 = arith.constant 0 : index
    %4 = vector.load %arg3[%c0_3, %c0_4] : memref<3x512xf32, #tpu.memory_space<vmem>>, vector<1x512xf32>
    %5 = vector.broadcast %4 : vector<1x512xf32> to vector<8x512xf32>
    %6 = arith.addf %3, %5 : vector<8x512xf32>
    %7 = tpu.iota {dimensions = array<i32: 1>} : vector<8x512xi32>
    %c400_i32 = arith.constant 400 : i32
    %8 = vector.broadcast %c400_i32 : i32 to vector<8x512xi32>
    %9 = arith.cmpi slt, %7, %8 : vector<8x512xi32>
    %cst_5 = arith.constant 0.000000e+00 : f32
    %10 = vector.broadcast %cst_5 : f32 to vector<8x512xf32>
    %11 = arith.select %9, %6, %10 : vector<8x512xi1>, vector<8x512xf32>
    %cst_6 = arith.constant dense<0.000000e+00> : vector<8xf32>
    %12 = vector.multi_reduction <add>, %11, %cst_6 [1] : vector<8x512xf32> to vector<8xf32>
    %13 = vector.shape_cast %12 : vector<8xf32> to vector<8x1xf32>
    %cst_7 = arith.constant 2.500000e-03 : f32
    %14 = vector.broadcast %cst_7 : f32 to vector<8x1xf32>
    %15 = arith.mulf %13, %14 : vector<8x1xf32>
    %16 = arith.mulf %11, %11 : vector<8x512xf32>
    %cst_8 = arith.constant dense<0.000000e+00> : vector<8xf32>
    %17 = vector.multi_reduction <add>, %16, %cst_8 [1] : vector<8x512xf32> to vector<8xf32>
    %18 = vector.shape_cast %17 : vector<8xf32> to vector<8x1xf32>
    %cst_9 = arith.constant 2.500000e-03 : f32
    %19 = vector.broadcast %cst_9 : f32 to vector<8x1xf32>
    %20 = arith.mulf %18, %19 : vector<8x1xf32>
    %21 = arith.mulf %15, %15 : vector<8x1xf32>
    %22 = arith.subf %20, %21 : vector<8x1xf32>
    %cst_10 = arith.constant 0.000000e+00 : f32
    %23 = vector.broadcast %cst_10 : f32 to vector<8x1xf32>
    %24 = arith.maximumf %22, %23 : vector<8x1xf32>
    %25 = vector.broadcast %15 : vector<8x1xf32> to vector<8x512xf32>
    %26 = arith.subf %11, %25 : vector<8x512xf32>
    %cst_11 = arith.constant 9.99999974E-6 : f32
    %27 = vector.broadcast %cst_11 : f32 to vector<8x1xf32>
    %28 = arith.addf %24, %27 : vector<8x1xf32>
    %29 = math.rsqrt %28 : vector<8x1xf32>
    %30 = vector.broadcast %29 : vector<8x1xf32> to vector<8x512xf32>
    %31 = arith.mulf %26, %30 : vector<8x512xf32>
    %c1 = arith.constant 1 : index
    %c0_12 = arith.constant 0 : index
    %32 = vector.load %arg3[%c1, %c0_12] : memref<3x512xf32, #tpu.memory_space<vmem>>, vector<1x512xf32>
    %33 = vector.broadcast %32 : vector<1x512xf32> to vector<8x512xf32>
    %34 = arith.mulf %31, %33 : vector<8x512xf32>
    %c2 = arith.constant 2 : index
    %c0_13 = arith.constant 0 : index
    %35 = vector.load %arg3[%c2, %c0_13] : memref<3x512xf32, #tpu.memory_space<vmem>>, vector<1x512xf32>
    %36 = vector.broadcast %35 : vector<1x512xf32> to vector<8x512xf32>
    %37 = arith.addf %34, %36 : vector<8x512xf32>
    %c400_i32_14 = arith.constant 400 : i32
    %38 = vector.broadcast %c400_i32_14 : i32 to vector<8x512xi32>
    %39 = arith.cmpi sge, %7, %38 : vector<8x512xi32>
    %c406_i32 = arith.constant 406 : i32
    %40 = vector.broadcast %c406_i32 : i32 to vector<8x512xi32>
    %41 = arith.cmpi slt, %7, %40 : vector<8x512xi32>
    %42 = arith.andi %39, %41 : vector<8x512xi1>
    %cst_15 = arith.constant 0.000000e+00 : f32
    %43 = vector.broadcast %cst_15 : f32 to vector<8x512xf32>
    %44 = arith.maximumf %37, %43 : vector<8x512xf32>
    %45 = arith.select %42, %6, %44 : vector<8x512xi1>, vector<8x512xf32>
    %46 = arith.truncf %45 : vector<8x512xf32> to vector<8x512xbf16>
    %c0_16 = arith.constant 0 : index
    %c0_17 = arith.constant 0 : index
    %47 = vector.load %arg4[%c0_16, %c0_17] : memref<512x300xbf16, #tpu.memory_space<vmem>>, vector<512x300xbf16>
    %cst_18 = arith.constant dense<0.000000e+00> : vector<8x300xf32>
    %48 = tpu.matmul %46, %47, %cst_18 {dimension_numbers = #tpu.dot_dimension_numbers<[1], [0], [0], [1], [0, 0, 1, 1], [], []>} : vector<8x512xbf16>, vector<512x300xbf16>, vector<8x300xf32> -> vector<8x300xf32>
    %c0_19 = arith.constant 0 : index
    %c0_20 = arith.constant 0 : index
    %49 = vector.load %arg5[%c0_19, %c0_20] : memref<3x300xf32, #tpu.memory_space<vmem>>, vector<1x300xf32>
    %50 = vector.broadcast %49 : vector<1x300xf32> to vector<8x300xf32>
    %51 = arith.addf %48, %50 : vector<8x300xf32>
    %c1_21 = arith.constant 1 : index
    %c0_22 = arith.constant 0 : index
    %52 = vector.load %arg5[%c1_21, %c0_22] : memref<3x300xf32, #tpu.memory_space<vmem>>, vector<1x300xf32>
    %c2_23 = arith.constant 2 : index
    %c0_24 = arith.constant 0 : index
    %53 = vector.load %arg5[%c2_23, %c0_24] : memref<3x300xf32, #tpu.memory_space<vmem>>, vector<1x300xf32>
    %cst_25 = arith.constant dense<0.000000e+00> : vector<8xf32>
    %54 = vector.multi_reduction <add>, %51, %cst_25 [1] : vector<8x300xf32> to vector<8xf32>
    %55 = vector.shape_cast %54 : vector<8xf32> to vector<8x1xf32>
    %cst_26 = arith.constant 0.00333333341 : f32
    %56 = vector.broadcast %cst_26 : f32 to vector<8x1xf32>
    %57 = arith.mulf %55, %56 : vector<8x1xf32>
    %58 = arith.mulf %51, %51 : vector<8x300xf32>
    %cst_27 = arith.constant dense<0.000000e+00> : vector<8xf32>
    %59 = vector.multi_reduction <add>, %58, %cst_27 [1] : vector<8x300xf32> to vector<8xf32>
    %60 = vector.shape_cast %59 : vector<8xf32> to vector<8x1xf32>
    %cst_28 = arith.constant 0.00333333341 : f32
    %61 = vector.broadcast %cst_28 : f32 to vector<8x1xf32>
    %62 = arith.mulf %60, %61 : vector<8x1xf32>
    %63 = arith.mulf %57, %57 : vector<8x1xf32>
    %64 = arith.subf %62, %63 : vector<8x1xf32>
    %cst_29 = arith.constant 0.000000e+00 : f32
    %65 = vector.broadcast %cst_29 : f32 to vector<8x1xf32>
    %66 = arith.maximumf %64, %65 : vector<8x1xf32>
    %67 = vector.broadcast %57 : vector<8x1xf32> to vector<8x300xf32>
    %68 = arith.subf %51, %67 : vector<8x300xf32>
    %cst_30 = arith.constant 9.99999974E-6 : f32
    %69 = vector.broadcast %cst_30 : f32 to vector<8x1xf32>
    %70 = arith.addf %66, %69 : vector<8x1xf32>
    %71 = math.rsqrt %70 : vector<8x1xf32>
    %72 = vector.broadcast %71 : vector<8x1xf32> to vector<8x300xf32>
    %73 = arith.mulf %68, %72 : vector<8x300xf32>
    %74 = vector.broadcast %52 : vector<1x300xf32> to vector<8x300xf32>
    %75 = arith.mulf %73, %74 : vector<8x300xf32>
    %76 = vector.broadcast %53 : vector<1x300xf32> to vector<8x300xf32>
    %77 = arith.addf %75, %76 : vector<8x300xf32>
    %cst_31 = arith.constant 0.000000e+00 : f32
    %78 = vector.broadcast %cst_31 : f32 to vector<8x300xf32>
    %79 = arith.maximumf %77, %78 : vector<8x300xf32>
    %80 = arith.truncf %79 : vector<8x300xf32> to vector<8x300xbf16>
    %c0_32 = arith.constant 0 : index
    %c0_33 = arith.constant 0 : index
    %81 = vector.load %arg6[%c0_32, %c0_33] : memref<300x200xbf16, #tpu.memory_space<vmem>>, vector<300x200xbf16>
    %cst_34 = arith.constant dense<0.000000e+00> : vector<8x200xf32>
    %82 = tpu.matmul %80, %81, %cst_34 {dimension_numbers = #tpu.dot_dimension_numbers<[1], [0], [0], [1], [0, 0, 1, 1], [], []>} : vector<8x300xbf16>, vector<300x200xbf16>, vector<8x200xf32> -> vector<8x200xf32>
    %c0_35 = arith.constant 0 : index
    %c0_36 = arith.constant 0 : index
    %83 = vector.load %arg7[%c0_35, %c0_36] : memref<4x200xf32, #tpu.memory_space<vmem>>, vector<1x200xf32>
    %84 = vector.broadcast %83 : vector<1x200xf32> to vector<8x200xf32>
    %85 = arith.addf %82, %84 : vector<8x200xf32>
    %c1_37 = arith.constant 1 : index
    %c0_38 = arith.constant 0 : index
    %86 = vector.load %arg7[%c1_37, %c0_38] : memref<4x200xf32, #tpu.memory_space<vmem>>, vector<1x200xf32>
    %c2_39 = arith.constant 2 : index
    %c0_40 = arith.constant 0 : index
    %87 = vector.load %arg7[%c2_39, %c0_40] : memref<4x200xf32, #tpu.memory_space<vmem>>, vector<1x200xf32>
    %cst_41 = arith.constant dense<0.000000e+00> : vector<8xf32>
    %88 = vector.multi_reduction <add>, %85, %cst_41 [1] : vector<8x200xf32> to vector<8xf32>
    %89 = vector.shape_cast %88 : vector<8xf32> to vector<8x1xf32>
    %cst_42 = arith.constant 5.000000e-03 : f32
    %90 = vector.broadcast %cst_42 : f32 to vector<8x1xf32>
    %91 = arith.mulf %89, %90 : vector<8x1xf32>
    %92 = arith.mulf %85, %85 : vector<8x200xf32>
    %cst_43 = arith.constant dense<0.000000e+00> : vector<8xf32>
    %93 = vector.multi_reduction <add>, %92, %cst_43 [1] : vector<8x200xf32> to vector<8xf32>
    %94 = vector.shape_cast %93 : vector<8xf32> to vector<8x1xf32>
    %cst_44 = arith.constant 5.000000e-03 : f32
    %95 = vector.broadcast %cst_44 : f32 to vector<8x1xf32>
    %96 = arith.mulf %94, %95 : vector<8x1xf32>
    %97 = arith.mulf %91, %91 : vector<8x1xf32>
    %98 = arith.subf %96, %97 : vector<8x1xf32>
    %cst_45 = arith.constant 0.000000e+00 : f32
    %99 = vector.broadcast %cst_45 : f32 to vector<8x1xf32>
    %100 = arith.maximumf %98, %99 : vector<8x1xf32>
    %101 = vector.broadcast %91 : vector<8x1xf32> to vector<8x200xf32>
    %102 = arith.subf %85, %101 : vector<8x200xf32>
    %cst_46 = arith.constant 9.99999974E-6 : f32
    %103 = vector.broadcast %cst_46 : f32 to vector<8x1xf32>
    %104 = arith.addf %100, %103 : vector<8x1xf32>
    %105 = math.rsqrt %104 : vector<8x1xf32>
    %106 = vector.broadcast %105 : vector<8x1xf32> to vector<8x200xf32>
    %107 = arith.mulf %102, %106 : vector<8x200xf32>
    %108 = vector.broadcast %86 : vector<1x200xf32> to vector<8x200xf32>
    %109 = arith.mulf %107, %108 : vector<8x200xf32>
    %110 = vector.broadcast %87 : vector<1x200xf32> to vector<8x200xf32>
    %111 = arith.addf %109, %110 : vector<8x200xf32>
    %cst_47 = arith.constant 0.000000e+00 : f32
    %112 = vector.broadcast %cst_47 : f32 to vector<8x200xf32>
    %113 = arith.maximumf %111, %112 : vector<8x200xf32>
    %c3 = arith.constant 3 : index
    %c0_48 = arith.constant 0 : index
    %114 = vector.load %arg7[%c3, %c0_48] : memref<4x200xf32, #tpu.memory_space<vmem>>, vector<1x200xf32>
    %115 = vector.broadcast %114 : vector<1x200xf32> to vector<8x200xf32>
    %116 = arith.mulf %113, %115 : vector<8x200xf32>
    %cst_49 = arith.constant dense<0.000000e+00> : vector<8xf32>
    %117 = vector.multi_reduction <add>, %116, %cst_49 [1] : vector<8x200xf32> to vector<8xf32>
    %c0_50 = arith.constant 0 : index
    %118 = memref.load %arg8[%c0_50] : memref<1xf32, #tpu.memory_space<smem>>
    %119 = vector.broadcast %118 : f32 to vector<8xf32>
    %120 = arith.addf %117, %119 : vector<8xf32>
    %121 = vector.shape_cast %120 : vector<8xf32> to vector<1x1x8xf32>
    %c0_51 = arith.constant 0 : index
    %c0_52 = arith.constant 0 : index
    %c0_53 = arith.constant 0 : index
    %122 = vector.load %arg9[%c0_51, %c0_52, %c0_53] : memref<1x1x8xf32, #tpu.memory_space<vmem>>, vector<1x1x8xf32>
    tpu.vector_store %arg9[%c0_51, %c0_52, %c0_53], %121 {strides = array<i32>} : memref<1x1x8xf32, #tpu.memory_space<vmem>>, vector<1x1x8xf32>,
    return
  }
  func.func @transform_0(%arg0: i32) -> (i32, i32) {
    %c0_i32 = arith.constant 0 : i32
    %c0_i32_0 = arith.constant 0 : i32
    return %arg0, %c0_i32 : i32, i32
  }
  func.func @transform_1(%arg0: i32) -> (i32, i32) {
    %c0_i32 = arith.constant 0 : i32
    %c0_i32_0 = arith.constant 0 : i32
    %c0_i32_1 = arith.constant 0 : i32
    return %c0_i32, %c0_i32_0 : i32, i32
  }
  func.func @transform_2(%arg0: i32) -> (i32, i32) {
    %c0_i32 = arith.constant 0 : i32
    %c0_i32_0 = arith.constant 0 : i32
    %c0_i32_1 = arith.constant 0 : i32
    return %c0_i32, %c0_i32_0 : i32, i32
  }
  func.func @transform_3(%arg0: i32) -> (i32, i32) {
    %c0_i32 = arith.constant 0 : i32
    %c0_i32_0 = arith.constant 0 : i32
    %c0_i32_1 = arith.constant 0 : i32
    return %c0_i32, %c0_i32_0 : i32, i32
  }
  func.func @transform_4(%arg0: i32) -> (i32, i32) {
    %c0_i32 = arith.constant 0 : i32
    %c0_i32_0 = arith.constant 0 : i32
    %c0_i32_1 = arith.constant 0 : i32
    return %c0_i32, %c0_i32_0 : i32, i32
  }
  func.func @transform_5(%arg0: i32) -> (i32, i32) {
    %c0_i32 = arith.constant 0 : i32
    %c0_i32_0 = arith.constant 0 : i32
    %c0_i32_1 = arith.constant 0 : i32
    return %c0_i32, %c0_i32_0 : i32, i32
  }
  func.func @transform_6(%arg0: i32) -> (i32, i32) {
    %c0_i32 = arith.constant 0 : i32
    %c0_i32_0 = arith.constant 0 : i32
    %c0_i32_1 = arith.constant 0 : i32
    return %c0_i32, %c0_i32_0 : i32, i32
  }
  func.func @transform_7(%arg0: i32) -> i32 {
    %c0_i32 = arith.constant 0 : i32
    %c0_i32_0 = arith.constant 0 : i32
    return %c0_i32 : i32
  }
  func.func @transform_8(%arg0: i32) -> (i32, i32, i32) {
    %c0_i32 = arith.constant 0 : i32
    %c0_i32_0 = arith.constant 0 : i32
    %c0_i32_1 = arith.constant 0 : i32
    return %arg0, %c0_i32, %c0_i32_0 : i32, i32, i32
  }
}

</mosaic_0001>

<bundles_post_ra>
// kernel: enhanced_critic_forward.1
= control target key start
LH: loop header
LB: loop body
LE: loop exit
PB: predicated region body
PF: predicated region fallthrough
CT: control target
= control target key end

     0   :  { %v2044_v1 = vmov 0   ;;  %vm103_vm0 = vcmask 1045504   ;;  %vm99_vm1 = vcmask 228352   ;;  %v43_v29 = vlaneseq  ;;  %s2695_s1 = inlined_call_operand.vmem [shape: bf16[28,512], index: 1, kind: input, shape index: {}]   ;;  %s2696_s0 = inlined_call_operand.vmem [shape: f32[8,28], index: 0, kind: input, shape index: {}]   ;;  %s2697_s3 = inlined_call_operand.vmem [shape: bf16[512,300], index: 3, kind: input, shape index: {}]   ;;  %s2698_s2 = inlined_call_operand.vmem [shape: f32[3,512], index: 2, kind: input, shape index: {}]   ;;  %s2699_s5 = inlined_call_operand.vmem [shape: bf16[300,200], index: 5, kind: input, shape index: {}]   ;;  %s2700_s4 = inlined_call_operand.vmem [shape: f32[3,300], index: 4, kind: input, shape index: {}]   ;;  %s2701_s6 = inlined_call_operand.vmem [shape: f32[4,200], index: 6, kind: input, shape index: {}]   ;;  %s2702_s7 = inlined_call_operand.<no memory space> [shape: f32[1], index: 7, kind: input, shape index: {}]   ;;  %s2703_s8 = inlined_call_operand.vmem [shape: f32[1,1,8], index: 8, kind: output, shape index: {}]  }
   0x1   :  { %v1841_v0 = vld [vmem:[%s2695_s1 + $0x4] ss:$16 sps:$4 sm:$0xff]   ;;  %148 = vmatprep.mubr.bf16.mxu0 %v2044_v1  ;;  %v1843_v2 = vld [vmem:[%s2695_s1] ss:$16 sps:$4 sm:$0xff]   ;;  %v1849_v7 = vld [vmem:[%s2695_s1 + $0xc] ss:$16 sps:$4 sm:$0xff]  }
   0x2   :  { %116 = vmatprep.subr.bf16.mxu0 %v1841_v0  ;;  %v1844_v3 = vld [vmem:[%s2695_s1 + $0x24] ss:$16 sps:$4 sm:$0x3f]   ;;  %v1846_v4 = vld [vmem:[%s2695_s1 + $0x20] ss:$16 sps:$4 sm:$0x3f]  }
   0x3   :  { %117 = vmatpush1.bf16.msra.mxu0 %v1843_v2  ;;  %v31_v5 = vld [vmem:[%s2696_s0] sm:$0xff]  ;;  %v105_v6 = vsel %vm103_vm0, %v1846_v4, 0  ;;  %v1847_v9 = vld [vmem:[%s2695_s1 + $0x8] ss:$16 sps:$4 sm:$0xff]   ;;  %v1859_v18 = vld [vmem:[%s2697_s3 + $0x30] ss:$12 sps:$4 sm:$0xff]  }
   0x4   :  { %1637 = vmatprep.subr.msk.bf16.mxu0 %vm103_vm0, %v1844_v3  ;;  %v32_v8 = vpack.c.bf16 %v31_v5, %v31_v5  ;;  %v1850_v10 = vld [vmem:[%s2695_s1 + $0x2c] ss:$16 sps:$4 sm:$0x3f]   ;;  %v1852_v11 = vld [vmem:[%s2695_s1 + $0x28] ss:$16 sps:$4 sm:$0x3f]  }
   0x5   :  { %v111_v12 = vsel %vm103_vm0, %v1852_v11, 0  ;;  %v1853_v13 = vld [vmem:[%s2697_s3] ss:$12 sps:$4 sm:$0xff]   ;;  %v1855_v14 = vld [vmem:[%s2697_s3 + $0x4] ss:$12 sps:$4 sm:$0xff]   ;;  %v2171_v30 = vshrl.u32 %v43_v29, 7 }
   0x6   :  { %v1858_v15 = vld [vmem:[%s2697_s3 + $0x1c] ss:$12 sps:$4 sm:$0xff]   ;;  %v1856_v16 = vld [vmem:[%s2697_s3 + $0x18] ss:$12 sps:$4 sm:$0xff]   ;;  %v1861_v17 = vld [vmem:[%s2697_s3 + $0x34] ss:$12 sps:$4 sm:$0xff]  }
   0x7   :  { %119 = vmatpush1.bf16.msra.mxu0 %v105_v6  ;;  %v1864_v19 = vld [vmem:[%s2697_s3 + $0x4c] ss:$12 sps:$4 sm:$0xff]   ;;  %v1862_v20 = vld [vmem:[%s2697_s3 + $0x48] ss:$12 sps:$4 sm:$0xff]   ;;  %v1867_v21 = vld [vmem:[%s2697_s3 + $0x64] ss:$12 sps:$4 sm:$0xff]  }
   0x8   :  { %157 = vmatprep.subr.bf16.mxu0 %v1849_v7  ;;  %v1865_v22 = vld [vmem:[%s2697_s3 + $0x60] ss:$12 sps:$4 sm:$0xff]   ;;  %v1870_v23 = vld [vmem:[%s2697_s3 + $0x7c] ss:$12 sps:$4 sm:$0xff]   ;;  %v1868_v24 = vld [vmem:[%s2697_s3 + $0x78] ss:$12 sps:$4 sm:$0xff]  }
   0x9   :  { %v1873_v25 = vld [vmem:[%s2697_s3 + $0x94] ss:$12 sps:$4 sm:$0xff]   ;;  %v1871_v26 = vld [vmem:[%s2697_s3 + $0x90] ss:$12 sps:$4 sm:$0xff]   ;;  %v1876_v27 = vld [vmem:[%s2697_s3 + $0xac] ss:$12 sps:$4 sm:$0xff]  }
   0xa   :  { %1638 = vmatmul.mubr.msk.bf16.vlgmr.msra.gmra.mrb[0].mxu0 %vm99_vm1, %v32_v8  ;;  %v1874_v28 = vld [vmem:[%s2697_s3 + $0xa8] ss:$12 sps:$4 sm:$0xff]   ;;  %v2174_v31 = vsub.s32 0, %v2171_v30  ;;  %v2177_v32 = vsub.s32 1, %v2171_v30  ;;  %v2185_v38 = vsub.s32 2, %v2171_v30  ;;  %v2187_v39 = vand.u32 127, %v43_v29 }
   0xb   :  { %158 = vmatpush1.bf16.msra.mxu0 %v1847_v9  ;;  %189 = vmatprep.mubr.bf16.mxu0 %v2044_v1  ;;  %v41_v33 = vld [vmem:[%s2698_s2] ss:$4 sm:$0xf]  ;;  %v2190_v41 = vsub.s32 3, %v2171_v30  ;;  %vm1142_vm6 = vcmask 359424   ;;  %vm1545_vm7 = vcmask 588800  }
   0xc   :  { %1639 = vmatprep.subr.msk.bf16.mxu0 %vm103_vm0, %v1850_v10  ;;  %v46_v34 = vrot.slane %v41_v33, %v2174_v31  ;;  %v50_v35 = vrot.slane %v41_v33, %v2177_v32  ;;  %v54_v45 = vrot.slane %v41_v33, %v2185_v38  ;;  %v2198_v46 = vadd.s32 384, %v2187_v39  ;;  %v1879_v2 = vld [vmem:[%s2697_s3 + $0xc4] ss:$12 sps:$4 sm:$0xff]   ;;  %v1880_v3 = vld [vmem:[%s2697_s3 + $0xc8] ss:$12 sps:$4 sm:$0xff]  }
   0xd   :  { %v58_v47 = vrot.slane %v41_v33, %v2190_v41  ;;  %v1877_v4 = vld [vmem:[%s2697_s3 + $0xc0] ss:$12 sps:$4 sm:$0xff]   ;;  %v1881_v5 = vld [vmem:[%s2697_s3 + $0x8] ss:$12 sps:$4 sm:$0xff]   ;;  %1784 = vmatprep.subr.bf16.mxu1 %v1880_v3  ;;  %v1890_v11 = vld [vmem:[%s2697_s3 + $0xf8] ss:$12 sps:$4 sm:$0xff]  }
   0xe   :  { %vm206_vm2 = vcmp.lt.s32.totalorder %v2198_v46, 400  ;;  %1785 = vmatpush3.bf16.msra.mxu1 %v1881_v5  ;;  %v1884_v6 = vld [vmem:[%s2697_s3 + $0xdc] ss:$12 sps:$4 sm:$0xff]   ;;  %v1885_v7 = vld [vmem:[%s2697_s3 + $0xe0] ss:$12 sps:$4 sm:$0xff]   ;;  %vm297_vm3 = vcmp.ge.s32.totalorder %v2198_v46, 400 }
   0xf   :  { %160 = vmatpush1.bf16.msra.mxu0 %v111_v12  ;;  %v1886_v9 = vld [vmem:[%s2697_s3 + $0x20] ss:$12 sps:$4 sm:$0xff]   ;;  %1786 = vmatprep.subr.bf16.mxu1 %v1885_v7  ;;  %v1887_v12 = vld [vmem:[%s2697_s3 + $0xf0] ss:$12 sps:$4 sm:$0xff]   ;;  %v1911_v29 = vld [vmem:[%s2697_s3 + $0x98] ss:$12 sps:$4 sm:$0xff]  }
  0x10   :  { %975 = vmatprep.subr.bf16.mxu0 %v1855_v14  ;;  %v1889_v10 = vld [vmem:[%s2697_s3 + $0xf4] ss:$12 sps:$4 sm:$0xff]   ;;  %v1894_v14 = vld [vmem:[%s2697_s3 + $0x10c] ss:$12 sps:$4 sm:$0xff]   ;;  %vm301_vm4 = vcmp.lt.s32.totalorder %v2198_v46, 406  ;;  %vm1623_vm8 = vcmask 57344  }
  0x11   :  { %v1914_v33 = vld [vmem:[%s2697_s3 + $0x16c] ss:$12 sps:$4 sm:$0xff]   ;;  %vm305_vm5 = vmand %vm297_vm3, %vm301_vm4 }
  0x12   :  { %1640 = vmatmul.mubr.msk.bf16.vlgmr.msra.gmra.mrb[4].mxu0 %vm99_vm1, %v32_v8  ;;  %v1882_v8 = vld [vmem:[%s2697_s3 + $0xd8] ss:$12 sps:$4 sm:$0xff]   ;;  %1787 = vmatpush3.bf16.msra.mxu1 %v1886_v9 }
  0x13   :  { %976 = vmatpush1.bf16.msra.mxu0 %v1853_v13  ;;  %v1891_v13 = vld [vmem:[%s2697_s3 + $0x38] ss:$12 sps:$4 sm:$0xff]   ;;  %1788 = vmatprep.subr.bf16.mxu1 %v1890_v11 }
  0x14   :  { %977 = vmatprep.subr.bf16.mxu0 %v1858_v15  ;;  %v1895_v15 = vld [vmem:[%s2697_s3 + $0x110] ss:$12 sps:$4 sm:$0xff]  }
  0x16   :  { %1789 = vmatpush3.bf16.msra.mxu1 %v1891_v13 }
  0x17   :  { %978 = vmatpush1.bf16.msra.mxu0 %v1856_v16  ;;  %v1892_v16 = vld [vmem:[%s2697_s3 + $0x108] ss:$12 sps:$4 sm:$0xff]   ;;  %1790 = vmatprep.subr.bf16.mxu1 %v1895_v15  ;;  %v1917_v15 = vld [vmem:[%s2697_s3 + $0x180] ss:$12 sps:$4 sm:$0xff]  }
  0x18   :  { %979 = vmatprep.subr.bf16.mxu0 %v1861_v17  ;;  %v1896_v17 = vld [vmem:[%s2697_s3 + $0x50] ss:$12 sps:$4 sm:$0xff]  }
  0x1a   :  { %1791 = vmatpush3.bf16.msra.mxu1 %v1896_v17 }
  0x1b   :  { %980 = vmatpush1.bf16.msra.mxu0 %v1859_v18  ;;  %v1899_v18 = vld [vmem:[%s2697_s3 + $0x124] ss:$12 sps:$4 sm:$0xff]  }
  0x1c   :  { %981 = vmatprep.subr.bf16.mxu0 %v1864_v19  ;;  %v1900_v19 = vld [vmem:[%s2697_s3 + $0x128] ss:$12 sps:$4 sm:$0xff]  }
  0x1d   :  { %1792 = vmatprep.subr.bf16.mxu1 %v1900_v19  ;;  %v1925_v19 = vld [vmem:[%s2697_s3 + $0x260] ss:$12 sps:$4 sm:$0xff]  }
  0x1f   :  { %982 = vmatpush1.bf16.msra.mxu0 %v1862_v20  ;;  %v1897_v20 = vld [vmem:[%s2697_s3 + $0x120] ss:$12 sps:$4 sm:$0xff]  }
  0x20   :  { %983 = vmatprep.subr.bf16.mxu0 %v1867_v21  ;;  %v1901_v21 = vld [vmem:[%s2697_s3 + $0x68] ss:$12 sps:$4 sm:$0xff]  }
  0x21   :  { %1793 = vmatpush3.bf16.msra.mxu1 %v1901_v21  ;;  %v1929_v21 = vld [vmem:[%s2697_s3 + $0x1b4] ss:$12 sps:$4 sm:$0xff]  }
  0x23   :  { %984 = vmatpush1.bf16.msra.mxu0 %v1865_v22  ;;  %v1904_v22 = vld [vmem:[%s2697_s3 + $0x13c] ss:$12 sps:$4 sm:$0xff]  }
  0x24   :  { %985 = vmatprep.subr.bf16.mxu0 %v1870_v23  ;;  %v1905_v23 = vld [vmem:[%s2697_s3 + $0x140] ss:$12 sps:$4 sm:$0xff]  }
  0x25   :  { %1794 = vmatprep.subr.bf16.mxu1 %v1905_v23  ;;  %v1927_v23 = vld [vmem:[%s2697_s3 + $0x1b0] ss:$12 sps:$4 sm:$0xff]  }
  0x27   :  { %986 = vmatpush1.bf16.msra.mxu0 %v1868_v24  ;;  %v1902_v24 = vld [vmem:[%s2697_s3 + $0x138] ss:$12 sps:$4 sm:$0xff]  }
  0x28   :  { %987 = vmatprep.subr.bf16.mxu0 %v1873_v25  ;;  %v1906_v25 = vld [vmem:[%s2697_s3 + $0x80] ss:$12 sps:$4 sm:$0xff]  }
  0x29   :  { %1795 = vmatpush3.bf16.msra.mxu1 %v1906_v25  ;;  %v1934_v25 = vld [vmem:[%s2697_s3 + $0x1cc] ss:$12 sps:$4 sm:$0xff]  }
  0x2b   :  { %988 = vmatpush1.bf16.msra.mxu0 %v1871_v26  ;;  %v1909_v26 = vld [vmem:[%s2697_s3 + $0x154] ss:$12 sps:$4 sm:$0xff]  }
  0x2c   :  { %989 = vmatprep.subr.bf16.mxu0 %v1876_v27  ;;  %v1910_v27 = vld [vmem:[%s2697_s3 + $0x158] ss:$12 sps:$4 sm:$0xff]  }
  0x2d   :  { %1796 = vmatprep.subr.bf16.mxu1 %v1910_v27  ;;  %v1932_v27 = vld [vmem:[%s2697_s3 + $0x1c8] ss:$12 sps:$4 sm:$0xff]  }
  0x2e   :  { %1797 = vmatpush3.bf16.msra.mxu1 %v1911_v29  ;;  %v1939_v29 = vld [vmem:[%s2697_s3 + $0x1e4] ss:$12 sps:$4 sm:$0xff]  }
  0x2f   :  { %990 = vmatpush1.bf16.msra.mxu0 %v1874_v28  ;;  %v1907_v28 = vld [vmem:[%s2697_s3 + $0x150] ss:$12 sps:$4 sm:$0xff]  }
  0x30   :  { %991 = vmatprep.subr.bf16.mxu0 %v1879_v2 }
  0x33   :  { %992 = vmatpush1.bf16.msra.mxu0 %v1877_v4 }
  0x34   :  { %993 = vmatprep.subr.bf16.mxu0 %v1884_v6 }
  0x37   :  { %994 = vmatpush1.bf16.msra.mxu0 %v1882_v8 }
  0x38   :  { %995 = vmatprep.subr.bf16.mxu0 %v1889_v10 }
  0x3b   :  { %996 = vmatpush1.bf16.msra.mxu0 %v1887_v12 }
  0x3c   :  { %997 = vmatprep.subr.bf16.mxu0 %v1894_v14 }
  0x3f   :  { %998 = vmatpush1.bf16.msra.mxu0 %v1892_v16  ;;  %v1921_v16 = vld [vmem:[%s2697_s3 + $0x188] ss:$12 sps:$4 sm:$0xff]  }
  0x40   :  { %999 = vmatprep.subr.bf16.mxu0 %v1899_v18  ;;  %v1924_v18 = vld [vmem:[%s2697_s3 + $0x19c] ss:$12 sps:$4 sm:$0xff]  }
  0x43   :  { %1000 = vmatpush1.bf16.msra.mxu0 %v1897_v20  ;;  %v1922_v20 = vld [vmem:[%s2697_s3 + $0x198] ss:$12 sps:$4 sm:$0xff]  }
  0x44   :  { %1001 = vmatprep.subr.bf16.mxu0 %v1904_v22  ;;  %v1930_v22 = vld [vmem:[%s2697_s3 + $0x278] ss:$12 sps:$4 sm:$0xff]  }
  0x47   :  { %1002 = vmatpush1.bf16.msra.mxu0 %v1902_v24  ;;  %v1931_v24 = vld [vmem:[%s2697_s3 + $0x1b8] ss:$12 sps:$4 sm:$0xff]  }
  0x48   :  { %1003 = vmatprep.subr.bf16.mxu0 %v1909_v26  ;;  %v1935_v26 = vld [vmem:[%s2697_s3 + $0x290] ss:$12 sps:$4 sm:$0xff]  }
  0x4b   :  { %1004 = vmatpush1.bf16.msra.mxu0 %v1907_v28  ;;  %v1936_v28 = vld [vmem:[%s2697_s3 + $0x1d0] ss:$12 sps:$4 sm:$0xff]  }
  0x4c   :  { %1005 = vmatprep.subr.bf16.mxu0 %v1914_v33  ;;  %v1940_v33 = vld [vmem:[%s2697_s3 + $0x2a8] ss:$12 sps:$4 sm:$0xff]  }
  0xdd   :  { %v150_v36 = vpop.f32.mrb[0].mxu0 }
  0xde   :  { %v152_v37 = vpop.f32.mrb[1].mxu0  ;;  %v2192_v42 = vadd.f32 %v150_v36, %v46_v34  ;;  %v1915_v34 = vld [vmem:[%s2697_s3 + $0x170] ss:$12 sps:$4 sm:$0xff]  }
  0xdf   :  { %v154_v40 = vpop.f32.mrb[2].mxu0  ;;  %v2194_v43 = vadd.f32 %v152_v37, %v50_v35  ;;  %v1912_v35 = vld [vmem:[%s2697_s3 + $0x168] ss:$12 sps:$4 sm:$0xff]   ;;  %v1916_v36 = vld [vmem:[%s2697_s3 + $0xb0] ss:$12 sps:$4 sm:$0xff]   ;;  %1798 = vmatprep.subr.bf16.mxu1 %v1915_v34 }
  0xe0   :  { %v155_v44 = vpop.f32.mrb[3].mxu0  ;;  %v217_v48 = vmul.f32 %v2192_v42, %v2192_v42  ;;  %1006 = vmatpush1.bf16.msra.mxu0 %v1912_v35  ;;  %1799 = vmatpush3.bf16.msra.mxu1 %v1916_v36  ;;  %v1919_v37 = vld [vmem:[%s2697_s3 + $0x184] ss:$12 sps:$4 sm:$0xff]   ;;  %v1920_v40 = vld [vmem:[%s2697_s3 + $0x248] ss:$12 sps:$4 sm:$0xff]  }
  0xe1   :  { %v218_v49 = vmul.f32 %v2194_v43, %v2194_v43  ;;  %v211_v53 = vadd.f32 %v2194_v43, %v2192_v42  ;;  %1016 = vmatprep.subr.bf16.mxu0 %v1919_v37  ;;  %1806 = vmatprep.subr.bf16.mxu1 %v1920_v40  ;;  %v1937_v35 = vld [vmem:[%s2697_s3 + $0x1e0] ss:$12 sps:$4 sm:$0xff]   ;;  %v1941_v36 = vld [vmem:[%s2697_s3 + $0x1e8] ss:$12 sps:$4 sm:$0xff]  }
  0xe2   :  { %v1944_v37 = vld [vmem:[%s2697_s3 + $0x1fc] ss:$12 sps:$4 sm:$0xff]  }
  0xe3   :  { %v221_v59 = vadd.f32 %v218_v49, %v217_v48 }
  0xe5   :  { %v191_v50 = vpop.f32.mrb[4].mxu0 }
  0xe6   :  { %v2205_v51 = vadd.f32 %v191_v50, %v54_v45  ;;  %v193_v52 = vpop.f32.mrb[5].mxu0 }
  0xe7   :  { %v2210_v54 = vadd.f32 %v193_v52, %v58_v47  ;;  %v195_v55 = vpop.f32.mrb[6].mxu0 }
  0xe8   :  { %v219_v56 = vmul.f32 %v2205_v51, %v2205_v51  ;;  %v196_v57 = vpop.f32.mrb[7].mxu0  ;;  %v212_v58 = vadd.f32 %v211_v53, %v2205_v51  ;;  %v2330_v55 = vld [vmem:[%s2698_s2 + $0x1] ss:$4 sm:$0xf] }
  0xe9   :  { %v2216_v60 = vsel %vm206_vm2, %v2210_v54, 0.0  ;;  %v258_v57 = vrot.slane %v2330_v55, %v2190_v41 }
  0xea   :  { %v213_v61 = vadd.f32 %v212_v58, %v2216_v60  ;;  %v220_v62 = vmul.f32 %v2216_v60, %v2216_v60  ;;  %v222_v63 = vadd.f32 %v221_v59, %v219_v56  ;;  %v2335_v56 = vld [vmem:[%s2698_s2 + $0x2] ss:$4 sm:$0xf]  ;;  %v250_v58 = vrot.slane %v2330_v55, %v2177_v32 }
  0xeb   :  { %v277_v2 = vrot.slane %v2335_v56, %v2177_v32  ;;  %v273_v3 = vrot.slane %v2335_v56, %v2174_v31 }
  0xec   :  { %214 = vadd.xlane.f32.xlu0 %v213_v61  ;;  %v223_v0 = vadd.f32 %v222_v63, %v220_v62  ;;  %v246_v63 = vrot.slane %v2330_v55, %v2174_v31 }
  0xf0   :  { %224 = vadd.xlane.f32.xlu0 %v223_v0 }
 0x179   :  { %v215_v44 = vpop.xlane.xlu0 %214 }
 0x17a   :  { %v2323_v45 = vmul.f32 0.0025, %v215_v44  ;;  %v254_v44 = vrot.slane %v2330_v55, %v2185_v38  ;;  %v1951_v55 = vld [vmem:[%s2697_s3 + $0x218] ss:$12 sps:$4 sm:$0xff]  }
 0x17c   :  { %v227_v48 = vmul.f32 %v2323_v45, %v2323_v45  ;;  %v230_v59 = vsub.f32 %v2192_v42, %v2323_v45  ;;  %v233_v61 = vsub.f32 %v2216_v60, %v2323_v45  ;;  %v231_v62 = vsub.f32 %v2194_v43, %v2323_v45 }
 0x17d   :  { %v225_v47 = vpop.xlane.xlu0 %224  ;;  %v285_v43 = vrot.slane %v2335_v56, %v2190_v41  ;;  %v232_v34 = vsub.f32 %v2205_v51, %v2323_v45  ;;  %v1945_v51 = vld [vmem:[%s2697_s3 + $0x2c0] ss:$12 sps:$4 sm:$0xff]   ;;  %v1942_v45 = vld [vmem:[%s2697_s3 + $0x1f8] ss:$12 sps:$4 sm:$0xff]  }
 0x17e   :  { %v226_v49 = vmul.f32 0.0025, %v225_v47  ;;  %v1946_v47 = vld [vmem:[%s2697_s3 + $0x200] ss:$12 sps:$4 sm:$0xff]  }
 0x180   :  { %v228_v50 = vsub.f32 %v226_v49, %v227_v48  ;;  %v1949_v48 = vld [vmem:[%s2697_s3 + $0x214] ss:$12 sps:$4 sm:$0xff]   ;;  %v1950_v49 = vld [vmem:[%s2697_s3 + $0x2d8] ss:$12 sps:$4 sm:$0xff]  }
 0x182   :  { %v229_v52 = vmax.f32 %v228_v50, 0.0 }
 0x184   :  { %v234_v53 = vadd.f32 1e-05, %v229_v52  ;;  %v281_v52 = vrot.slane %v2335_v56, %v2185_v38  ;;  %v1955_v56 = vld [vmem:[%s2697_s3 + $0x2f0] ss:$12 sps:$4 sm:$0xff]  }
 0x186   :  { %2038 = vrsqrt.f32 %v234_v53  ;;  %v1947_v53 = vld [vmem:[%s2697_s3 + $0x210] ss:$12 sps:$4 sm:$0xff]  }
 0x190   :  { %v2349_v0 = vpop.eup %2038 }
 0x191   :  { %v237_v4 = vmul.f32 %v2349_v0, %v231_v62  ;;  %v236_v42 = vmul.f32 %v2349_v0, %v230_v59  ;;  %v239_v60 = vmul.f32 %v2349_v0, %v233_v61  ;;  %v238_v40 = vmul.f32 %v2349_v0, %v232_v34  ;;  %v1952_v59 = vld [vmem:[%s2697_s3 + $0x228] ss:$12 sps:$4 sm:$0xff]   ;;  %v1956_v61 = vld [vmem:[%s2697_s3 + $0x230] ss:$12 sps:$4 sm:$0xff]   ;;  %v1957_v0 = vld [vmem:[%s2697_s3 + $0x240] ss:$12 sps:$4 sm:$0xff]  }
 0x192   :  { %v1959_v62 = vld [vmem:[%s2697_s3 + $0x244] ss:$12 sps:$4 sm:$0xff]  }
 0x193   :  { %v264_v5 = vmul.f32 %v250_v58, %v237_v4  ;;  %v263_v6 = vmul.f32 %v246_v63, %v236_v42  ;;  %v266_v7 = vmul.f32 %v258_v57, %v239_v60  ;;  %v265_v50 = vmul.f32 %v254_v44, %v238_v40  ;;  %v1954_v57 = vld [vmem:[%s2697_s3 + $0x22c] ss:$12 sps:$4 sm:$0xff]   ;;  %v1965_v42 = vld [vmem:[%s2697_s3 + $0x274] ss:$12 sps:$4 sm:$0xff]   ;;  %v1963_v60 = vld [vmem:[%s2697_s3 + $0x270] ss:$12 sps:$4 sm:$0xff]  }
 0x194   :  { %v1960_v4 = vld [vmem:[%s2697_s3 + $0x258] ss:$12 sps:$4 sm:$0xff]  }
 0x195   :  { %v291_v8 = vadd.f32 %v277_v2, %v264_v5  ;;  %v290_v9 = vadd.f32 %v273_v3, %v263_v6  ;;  %v293_v10 = vadd.f32 %v285_v43, %v266_v7  ;;  %v292_v58 = vadd.f32 %v281_v52, %v265_v50  ;;  %v1962_v3 = vld [vmem:[%s2697_s3 + $0x25c] ss:$12 sps:$4 sm:$0xff]   ;;  %v1968_v43 = vld [vmem:[%s2697_s3 + $0x28c] ss:$12 sps:$4 sm:$0xff]   ;;  %v1971_v6 = vld [vmem:[%s2697_s3 + $0x2a4] ss:$12 sps:$4 sm:$0xff]  }
 0x196   :  { %v1966_v5 = vld [vmem:[%s2697_s3 + $0x288] ss:$12 sps:$4 sm:$0xff]   ;;  %v1969_v7 = vld [vmem:[%s2697_s3 + $0x2a0] ss:$12 sps:$4 sm:$0xff]  }
 0x197   :  { %v307_v11 = vmax.f32 %v291_v8, 0.0  ;;  %v306_v12 = vmax.f32 %v290_v9, 0.0  ;;  %v309_v13 = vmax.f32 %v293_v10, 0.0  ;;  %v308_v63 = vmax.f32 %v292_v58, 0.0  ;;  %v1974_v8 = vld [vmem:[%s2697_s3 + $0x2bc] ss:$12 sps:$4 sm:$0xff]  }
 0x198   :  { %v1972_v9 = vld [vmem:[%s2697_s3 + $0x2b8] ss:$12 sps:$4 sm:$0xff]   ;;  %v1977_v10 = vld [vmem:[%s2697_s3 + $0x2d4] ss:$12 sps:$4 sm:$0xff]  }
 0x199   :  { %v315_v14 = vpack.c.bf16 %v307_v11, %v307_v11  ;;  %v314_v41 = vpack.c.bf16 %v306_v12, %v306_v12  ;;  %v313_v17 = vsel %vm305_vm5, %v2210_v54, %v309_v13  ;;  %v1926_v54 = vld [vmem:[%s2697_s3 + $0x1a0] ss:$12 sps:$4 sm:$0xff]   ;;  %v316_v2 = vpack.c.bf16 %v308_v63, %v308_v63  ;;  %v1975_v11 = vld [vmem:[%s2697_s3 + $0x2d0] ss:$12 sps:$4 sm:$0xff]   ;;  %v1978_v13 = vld [vmem:[%s2697_s3 + $0x2e8] ss:$12 sps:$4 sm:$0xff]  }
 0x19a   :  { %v317_v46 = vpack.c.bf16 %v313_v17, %v313_v17  ;;  %v1980_v12 = vld [vmem:[%s2697_s3 + $0x2ec] ss:$12 sps:$4 sm:$0xff]  }
 0x19b   :  { %1007 = vmatprep.mubr.bf16.mxu0 %v315_v14  ;;  %1089 = vmatprep.mubr.bf16.mxu1 %v315_v14  ;;  %v1981_v14 = vld [vmem:[%s2699_s5] ss:$8 sps:$4 sm:$0xff]   ;;  %v1989_v17 = vld [vmem:[%s2699_s5 + $0x24] ss:$8 sps:$4 sm:$0xff]  }
 0x19c   :  { %1008 = vmatmul.mubr.bf16.vlgmr.msra.gmra.mrb[8].mxu0 %v314_v41  ;;  %1090 = vmatmul.mubr.bf16.vlgmr.msra.gmra.mrb[0].mxu1 %v314_v41  ;;  %v1986_v41 = vld [vmem:[%s2699_s5 + $0x14] ss:$8 sps:$4 sm:$0xff]  }
 0x19d   :  { %1017 = vmatpush1.bf16.msra.mxu0 %v1917_v15  ;;  %1807 = vmatpush3.bf16.msra.mxu1 %v1921_v16  ;;  %v1983_v15 = vld [vmem:[%s2699_s5 + $0x4] ss:$8 sps:$4 sm:$0xff]   ;;  %v1984_v16 = vld [vmem:[%s2699_s5 + $0x10] ss:$8 sps:$4 sm:$0xff]  }
 0x19e   :  { %1048 = vmatprep.mubr.bf16.mxu0 %v317_v46  ;;  %1129 = vmatprep.mubr.bf16.mxu1 %v317_v46  ;;  %v1987_v46 = vld [vmem:[%s2699_s5 + $0x20] ss:$8 sps:$4 sm:$0xff]  }
 0x19f   :  { %1018 = vmatprep.subr.bf16.mxu0 %v1924_v18  ;;  %1808 = vmatprep.subr.bf16.mxu1 %v1925_v19  ;;  %v1992_v18 = vld [vmem:[%s2699_s5 + $0x34] ss:$8 sps:$4 sm:$0xff]   ;;  %v1990_v19 = vld [vmem:[%s2699_s5 + $0x30] ss:$8 sps:$4 sm:$0xff]  }
 0x1a1   :  { %1019 = vmatpush1.bf16.msra.mxu0 %v1922_v20  ;;  %1809 = vmatpush3.bf16.msra.mxu1 %v1926_v54  ;;  %v1995_v20 = vld [vmem:[%s2699_s5 + $0x44] ss:$8 sps:$4 sm:$0xff]   ;;  %v1993_v54 = vld [vmem:[%s2699_s5 + $0x40] ss:$8 sps:$4 sm:$0xff]  }
 0x1a2   :  { %1020 = vmatprep.subr.bf16.mxu0 %v1929_v21  ;;  %1810 = vmatprep.subr.bf16.mxu1 %v1930_v22  ;;  %v1998_v21 = vld [vmem:[%s2699_s5 + $0x54] ss:$8 sps:$4 sm:$0xff]   ;;  %v1996_v22 = vld [vmem:[%s2699_s5 + $0x50] ss:$8 sps:$4 sm:$0xff]  }
 0x1a5   :  { %1021 = vmatpush1.bf16.msra.mxu0 %v1927_v23  ;;  %1811 = vmatpush3.bf16.msra.mxu1 %v1931_v24  ;;  %v2001_v23 = vld [vmem:[%s2699_s5 + $0x64] ss:$8 sps:$4 sm:$0xff]   ;;  %v1999_v24 = vld [vmem:[%s2699_s5 + $0x60] ss:$8 sps:$4 sm:$0xff]  }
 0x1a6   :  { %1022 = vmatprep.subr.bf16.mxu0 %v1934_v25  ;;  %1812 = vmatprep.subr.bf16.mxu1 %v1935_v26  ;;  %v2004_v25 = vld [vmem:[%s2699_s5 + $0x74] ss:$8 sps:$4 sm:$0xff]   ;;  %v2002_v26 = vld [vmem:[%s2699_s5 + $0x70] ss:$8 sps:$4 sm:$0xff]  }
 0x1a9   :  { %1023 = vmatpush1.bf16.msra.mxu0 %v1932_v27  ;;  %1813 = vmatpush3.bf16.msra.mxu1 %v1936_v28 }
 0x1aa   :  { %1024 = vmatprep.subr.bf16.mxu0 %v1939_v29  ;;  %1814 = vmatprep.subr.bf16.mxu1 %v1940_v33 }
 0x1ad   :  { %1025 = vmatpush1.bf16.msra.mxu0 %v1937_v35  ;;  %1815 = vmatpush3.bf16.msra.mxu1 %v1941_v36  ;;  %v446_v35 = vld [vmem:[%s2700_s4] ss:$4 sm:$0x7] }
 0x1ae   :  { %1026 = vmatprep.subr.bf16.mxu0 %v1944_v37  ;;  %1816 = vmatprep.subr.bf16.mxu1 %v1945_v51  ;;  %v459_v36 = vrot.slane %v446_v35, %v2185_v38  ;;  %v455_v50 = vrot.slane %v446_v35, %v2177_v32 }
 0x1b1   :  { %1027 = vmatpush1.bf16.msra.mxu0 %v1942_v45  ;;  %1817 = vmatpush3.bf16.msra.mxu1 %v1946_v47 }
 0x1b2   :  { %1028 = vmatprep.subr.bf16.mxu0 %v1949_v48  ;;  %1818 = vmatprep.subr.bf16.mxu1 %v1950_v49  ;;  %v451_v49 = vrot.slane %v446_v35, %v2174_v31 }
 0x1b5   :  { %1029 = vmatpush1.bf16.msra.mxu0 %v1947_v53  ;;  %1819 = vmatpush3.bf16.msra.mxu1 %v1951_v55 }
 0x1b6   :  { %1030 = vmatprep.subr.bf16.mxu0 %v1954_v57  ;;  %1820 = vmatprep.subr.bf16.mxu1 %v1955_v56 }
 0x1b9   :  { %1031 = vmatpush1.bf16.msra.mxu0 %v1952_v59  ;;  %1821 = vmatpush3.bf16.msra.mxu1 %v1956_v61 }
 0x1ba   :  { %1032 = vmatprep.subr.bf16.mxu0 %v1959_v62  ;;  %1459 = vmatprep.subr.bf16.mxu1 %v1983_v15  ;;  %v2025_v15 = vld [vmem:[%s2699_s5 + $0xe4] ss:$8 sps:$4 sm:$0xff]  }
 0x1bc   :  { %1130 = vmatmul.mubr.bf16.vlgmr.msra.gmra.mrb[4].mxu1 %v316_v2 }
 0x1bd   :  { %1033 = vmatpush1.bf16.msra.mxu0 %v1957_v0  ;;  %1460 = vmatpush1.bf16.msra.mxu1 %v1981_v14  ;;  %v2020_v14 = vld [vmem:[%s2699_s5 + $0xd0] ss:$8 sps:$4 sm:$0xff]  }
 0x1be   :  { %1034 = vmatprep.subr.bf16.mxu0 %v1962_v3  ;;  %1461 = vmatprep.subr.bf16.mxu1 %v1986_v41  ;;  %v2023_v41 = vld [vmem:[%s2699_s5 + $0xe0] ss:$8 sps:$4 sm:$0xff]  }
 0x1c1   :  { %1035 = vmatpush1.bf16.msra.mxu0 %v1960_v4  ;;  %1462 = vmatpush1.bf16.msra.mxu1 %v1984_v16  ;;  %v2028_v16 = vld [vmem:[%s2699_s5 + $0xf4] ss:$8 sps:$4 sm:$0xff]  }
 0x1c2   :  { %1036 = vmatprep.subr.bf16.mxu0 %v1965_v42  ;;  %1463 = vmatprep.subr.bf16.mxu1 %v1989_v17  ;;  %v2026_v17 = vld [vmem:[%s2699_s5 + $0xf0] ss:$8 sps:$4 sm:$0xff]  }
 0x1c5   :  { %1037 = vmatpush1.bf16.msra.mxu0 %v1963_v60  ;;  %1464 = vmatpush1.bf16.msra.mxu1 %v1987_v46  ;;  %v2007_v60 = vld [vmem:[%s2699_s5 + $0x84] ss:$8 sps:$4 sm:$0xff]  }
 0x1c6   :  { %1038 = vmatprep.subr.bf16.mxu0 %v1968_v43  ;;  %1465 = vmatprep.subr.bf16.mxu1 %v1992_v18  ;;  %v2005_v43 = vld [vmem:[%s2699_s5 + $0x80] ss:$8 sps:$4 sm:$0xff]   ;;  %v2031_v46 = vld [vmem:[%s2699_s5 + $0x104] ss:$8 sps:$4 sm:$0xff]  }
 0x1c9   :  { %1039 = vmatpush1.bf16.msra.mxu0 %v1966_v5  ;;  %1466 = vmatpush1.bf16.msra.mxu1 %v1990_v19  ;;  %v2010_v5 = vld [vmem:[%s2699_s5 + $0x94] ss:$8 sps:$4 sm:$0xff]  }
 0x1ca   :  { %1040 = vmatprep.subr.bf16.mxu0 %v1971_v6  ;;  %1467 = vmatprep.subr.bf16.mxu1 %v1995_v20  ;;  %v2008_v6 = vld [vmem:[%s2699_s5 + $0x90] ss:$8 sps:$4 sm:$0xff]  }
 0x1cd   :  { %1041 = vmatpush1.bf16.msra.mxu0 %v1969_v7  ;;  %1468 = vmatpush1.bf16.msra.mxu1 %v1993_v54  ;;  %v2013_v7 = vld [vmem:[%s2699_s5 + $0xa4] ss:$8 sps:$4 sm:$0xff]  }
 0x1ce   :  { %1042 = vmatprep.subr.bf16.mxu0 %v1974_v8  ;;  %1469 = vmatprep.subr.bf16.mxu1 %v1998_v21  ;;  %v2011_v8 = vld [vmem:[%s2699_s5 + $0xa0] ss:$8 sps:$4 sm:$0xff]  }
 0x1d1   :  { %1043 = vmatpush1.bf16.msra.mxu0 %v1972_v9  ;;  %1470 = vmatpush1.bf16.msra.mxu1 %v1996_v22  ;;  %v2014_v9 = vld [vmem:[%s2699_s5 + $0xb0] ss:$8 sps:$4 sm:$0xff]  }
 0x1d2   :  { %1044 = vmatprep.subr.bf16.mxu0 %v1977_v10  ;;  %1471 = vmatprep.subr.bf16.mxu1 %v2001_v23  ;;  %v2016_v10 = vld [vmem:[%s2699_s5 + $0xb4] ss:$8 sps:$4 sm:$0xff]  }
 0x1d5   :  { %1045 = vmatpush1.bf16.msra.mxu0 %v1975_v11  ;;  %1472 = vmatpush1.bf16.msra.mxu1 %v1999_v24  ;;  %v2019_v11 = vld [vmem:[%s2699_s5 + $0xc4] ss:$8 sps:$4 sm:$0xff]  }
 0x1d6   :  { %1046 = vmatprep.subr.bf16.mxu0 %v1980_v12  ;;  %1473 = vmatprep.subr.bf16.mxu1 %v2004_v25  ;;  %v2017_v12 = vld [vmem:[%s2699_s5 + $0xc0] ss:$8 sps:$4 sm:$0xff]  }
 0x1d7   :  { %v1739_v25 = vld [vmem:[%s2700_s4 + $0x1] ss:$4 sm:$0x7] }
 0x1d9   :  { %1047 = vmatpush1.bf16.msra.mxu0 %v1978_v13  ;;  %1474 = vmatpush1.bf16.msra.mxu1 %v2002_v26  ;;  %v2022_v13 = vld [vmem:[%s2699_s5 + $0xd4] ss:$8 sps:$4 sm:$0xff]   ;;  %v1740_v26 = vld [vmem:[%s2700_s4 + $0x2] ss:$4 sm:$0x7] }
 0x1da   :  { %1475 = vmatprep.subr.bf16.mxu1 %v2007_v60 }
 0x1dc   :  { %1049 = vmatmul.mubr.bf16.vlgmr.msra.gmra.mrb[8].mxu0 %v316_v2 }
 0x1dd   :  { %1476 = vmatpush1.bf16.msra.mxu1 %v2005_v43 }
 0x1de   :  { %1477 = vmatprep.subr.bf16.mxu1 %v2010_v5 }
 0x1e1   :  { %1478 = vmatpush1.bf16.msra.mxu1 %v2008_v6 }
 0x1e2   :  { %1479 = vmatprep.subr.bf16.mxu1 %v2013_v7 }
 0x1e5   :  { %1480 = vmatpush1.bf16.msra.mxu1 %v2011_v8 }
 0x1e6   :  { %1481 = vmatprep.subr.bf16.mxu1 %v2016_v10 }
 0x1e9   :  { %1482 = vmatpush1.bf16.msra.mxu1 %v2014_v9 }
 0x1ea   :  { %1483 = vmatprep.subr.bf16.mxu1 %v2019_v11 }
 0x1ed   :  { %1484 = vmatpush1.bf16.msra.mxu1 %v2017_v12 }
 0x1ee   :  { %1485 = vmatprep.subr.bf16.mxu1 %v2022_v13 }
 0x1f1   :  { %1486 = vmatpush1.bf16.msra.mxu1 %v2020_v14 }
 0x1f2   :  { %1487 = vmatprep.subr.bf16.mxu1 %v2025_v15 }
 0x1f5   :  { %1488 = vmatpush1.bf16.msra.mxu1 %v2023_v41 }
 0x1f6   :  { %1489 = vmatprep.subr.bf16.mxu1 %v2028_v16 }
 0x1f9   :  { %1490 = vmatpush1.bf16.msra.mxu1 %v2026_v17 }
 0x1fa   :  { %1500 = vmatprep.subr.bf16.mxu1 %v2031_v46 }
 0x26f   :  { %v1800_v27 = vpop.f32.mrb[0].mxu1 }
 0x270   :  { %v1801_v28 = vpop.f32.mrb[1].mxu1 }
 0x271   :  { %v1802_v29 = vadd.f32 %v1801_v28, %v1800_v27  ;;  %v1803_v33 = vpop.f32.mrb[2].mxu1 }
 0x272   :  { %v1804_v34 = vpop.f32.mrb[3].mxu1  ;;  %v1172_v33 = vrot.slane %v1739_v25, %v2174_v31 }
 0x273   :  { %v1092_v40 = vadd.f32 %v1802_v29, %v459_v36  ;;  %v1176_v29 = vrot.slane %v1739_v25, %v2177_v32  ;;  %v1195_v36 = vrot.slane %v1740_v26, %v2177_v32 }
 0x28f   :  { %v1822_v37 = vpop.f32.mrb[4].mxu1 }
 0x290   :  { %v1823_v51 = vpop.f32.mrb[5].mxu1 }
 0x291   :  { %v1824_v44 = vadd.f32 %v1823_v51, %v1822_v37  ;;  %v1825_v45 = vpop.f32.mrb[6].mxu1  ;;  %v1191_v51 = vrot.slane %v1740_v26, %v2174_v31 }
 0x292   :  { %v1826_v47 = vpop.f32.mrb[7].mxu1 }
 0x293   :  { %v2560_v48 = vadd.f32 %v1824_v44, %v1092_v40 }
 0x295   :  { %v1143_v63 = vsel %vm1142_vm6, %v2560_v48, 0.0  ;;  %v1150_v0 = vmul.f32 %v2560_v48, %v2560_v48 }
 0x297   :  { %v1152_v4 = vsel %vm1142_vm6, %v1150_v0, 0.0 }
 0x2af   :  { %v1050_v52 = vpop.f32.mrb[8].mxu0 }
 0x2b0   :  { %v2564_v53 = vadd.f32 %v1050_v52, %v451_v49  ;;  %v1052_v55 = vpop.f32.mrb[9].mxu0 }
 0x2b1   :  { %v2566_v57 = vadd.f32 %v1052_v55, %v455_v50  ;;  %v1054_v56 = vpop.f32.mrb[10].mxu0  ;;  %v1180_v50 = vrot.slane %v1739_v25, %v2185_v38 }
 0x2b2   :  { %v1148_v58 = vmul.f32 %v2564_v53, %v2564_v53  ;;  %v1055_v59 = vpop.f32.mrb[11].mxu0 }
 0x2b3   :  { %v1149_v61 = vmul.f32 %v2566_v57, %v2566_v57  ;;  %v1141_v62 = vadd.f32 %v2566_v57, %v2564_v53  ;;  %v1199_v59 = vrot.slane %v1740_v26, %v2185_v38  ;;  %v2037_v38 = vld [vmem:[%s2699_s5 + $0x120] ss:$8 sps:$4 sm:$0x3f]  }
 0x2b5   :  { %v1144_v2 = vadd.f32 %v1143_v63, %v1141_v62  ;;  %v1151_v3 = vadd.f32 %v1149_v61, %v1148_v58  ;;  %v2029_v58 = vld [vmem:[%s2699_s5 + $0x100] ss:$8 sps:$4 sm:$0xff]   ;;  %v2034_v61 = vld [vmem:[%s2699_s5 + $0x114] ss:$8 sps:$4 sm:$0xff]   ;;  %v2032_v62 = vld [vmem:[%s2699_s5 + $0x110] ss:$8 sps:$4 sm:$0xff]  }
 0x2b6   :  { %v2035_v63 = vld [vmem:[%s2699_s5 + $0x124] ss:$8 sps:$4 sm:$0x3f]  }
 0x2b7   :  { %1145 = vadd.xlane.f32.xlu1 %v1144_v2  ;;  %v1153_v42 = vadd.f32 %v1152_v4, %v1151_v3  ;;  %v1454_v2 = vsel %vm103_vm0, %v2037_v38, 0 }
 0x2bb   :  { %1154 = vadd.xlane.f32.xlu1 %v1153_v42 }
 0x344   :  { %v1146_v18 = vpop.xlane.xlu1 %1145 }
 0x345   :  { %v1147_v19 = vmul.f32 0.0033333334, %v1146_v18 }
 0x347   :  { %v1157_v54 = vmul.f32 %v1147_v19, %v1147_v19  ;;  %v1160_v27 = vsub.f32 %v2564_v53, %v1147_v19  ;;  %v1161_v28 = vsub.f32 %v2566_v57, %v1147_v19  ;;  %v1162_v45 = vsub.f32 %v2560_v48, %v1147_v19 }
 0x348   :  { %v1155_v20 = vpop.xlane.xlu1 %1154 }
 0x349   :  { %v1156_v21 = vmul.f32 0.0033333334, %v1155_v20 }
 0x34b   :  { %v1158_v22 = vsub.f32 %v1156_v21, %v1157_v54  ;;  %v1781_v21 = vld [vmem:[%s2701_s6 + $0x1] ss:$4 sm:$0x3] }
 0x34c   :  { %v1571_v25 = vrot.slane %v1781_v21, %v2174_v31  ;;  %v1575_v26 = vrot.slane %v1781_v21, %v2177_v32 }
 0x34d   :  { %v1159_v23 = vmax.f32 %v1158_v22, 0.0  ;;  %v1782_v22 = vld [vmem:[%s2701_s6 + $0x2] ss:$4 sm:$0x3] }
 0x34f   :  { %v1163_v24 = vadd.f32 1e-05, %v1159_v23 }
 0x351   :  { %2040 = vrsqrt.f32 %v1163_v24 }
 0x35b   :  { %v2041_v34 = vpop.eup %2040 }
 0x35c   :  { %v1166_v35 = vmul.f32 %v2041_v34, %v1161_v28  ;;  %v1165_v37 = vmul.f32 %v2041_v34, %v1160_v27  ;;  %v1167_v52 = vmul.f32 %v2041_v34, %v1162_v45  ;;  %v1588_v34 = vrot.slane %v1782_v22, %v2177_v32 }
 0x35e   :  { %v1185_v40 = vmul.f32 %v1176_v29, %v1166_v35  ;;  %v1184_v44 = vmul.f32 %v1172_v33, %v1165_v37  ;;  %v1186_v48 = vmul.f32 %v1180_v50, %v1167_v52  ;;  %v1584_v33 = vrot.slane %v1782_v22, %v2174_v31  ;;  %v1783_v35 = vld [vmem:[%s2701_s6 + $0x3] ss:$4 sm:$0x3] }
 0x35f   :  { %v1605_v45 = vrot.slane %v1783_v35, %v2177_v32 }
 0x360   :  { %v1204_v47 = vadd.f32 %v1195_v36, %v1185_v40  ;;  %v1203_v49 = vadd.f32 %v1191_v51, %v1184_v44  ;;  %v1205_v0 = vadd.f32 %v1199_v59, %v1186_v48  ;;  %v1601_v44 = vrot.slane %v1783_v35, %v2174_v31 }
 0x362   :  { %v1207_v53 = vmax.f32 %v1204_v47, 0.0  ;;  %v1206_v55 = vmax.f32 %v1203_v49, 0.0  ;;  %v1208_v3 = vmax.f32 %v1205_v0, 0.0 }
 0x364   :  { %v1210_v57 = vpack.c.bf16 %v1207_v53, %v1207_v53  ;;  %v1209_v56 = vpack.c.bf16 %v1206_v55, %v1206_v55  ;;  %v1211_v4 = vpack.c.bf16 %v1208_v3, %v1208_v3 }
 0x366   :  { %1491 = vmatprep.mubr.bf16.mxu1 %v1210_v57  ;;  %v1615_v57 = vstv %s2702_s7 }
 0x367   :  { %1492 = vmatmul.mubr.bf16.vlgmr.msra.gmra.mrb[8].mxu1 %v1209_v56  ;;  %v1620_v56 = vsub.s32 %v2187_v39, %v2171_v30 }
 0x368   :  { %1501 = vmatpush1.bf16.msra.mxu1 %v2029_v58  ;;  %1532 = vmatprep.mubr.bf16.mxu1 %v2044_v1  ;;  %v1250_v1 = vld [vmem:[%s2701_s6] ss:$4 sm:$0x3] }
 0x369   :  { %1502 = vmatprep.subr.bf16.mxu1 %v2034_v61  ;;  %v1255_v42 = vrot.slane %v1250_v1, %v2174_v31  ;;  %v1259_v60 = vrot.slane %v1250_v1, %v2177_v32 }
 0x36c   :  { %1503 = vmatpush1.bf16.msra.mxu1 %v2032_v62 }
 0x36d   :  { %1779 = vmatprep.subr.msk.bf16.mxu1 %vm103_vm0, %v2035_v63 }
 0x370   :  { %1505 = vmatpush1.bf16.msra.mxu1 %v1454_v2 }
 0x373   :  { %1780 = vmatmul.mubr.msk.bf16.vlgmr.msra.gmra.mrb[8].mxu1 %vm1142_vm6, %v1211_v4 }
 0x446   :  { %v1534_v43 = vpop.f32.mrb[8].mxu1 }
 0x447   :  { %v1830_v5 = vadd.f32 %v1534_v43, %v1255_v42  ;;  %v1536_v6 = vpop.f32.mrb[9].mxu1 }
 0x448   :  { %v1831_v7 = vadd.f32 %v1536_v6, %v1259_v60  ;;  %v1538_v8 = vpop.f32.mrb[10].mxu1 }
 0x449   :  { %v1539_v9 = vpop.f32.mrb[11].mxu1  ;;  %v1551_v13 = vmul.f32 %v1830_v5, %v1830_v5 }
 0x44a   :  { %v1546_v10 = vsel %vm1545_vm7, %v1831_v7, 0.0  ;;  %v1552_v11 = vmul.f32 %v1831_v7, %v1831_v7 }
 0x44b   :  { %v1547_v12 = vadd.f32 %v1830_v5, %v1546_v10 }
 0x44c   :  { %v1553_v14 = vsel %vm1545_vm7, %v1552_v11, 0.0 }
 0x44d   :  { %1548 = vadd.xlane.f32.xlu0 %v1547_v12  ;;  %v1554_v15 = vadd.f32 %v1553_v14, %v1551_v13 }
 0x44f   :  { %1555 = vadd.xlane.f32.xlu1 %v1554_v15 }
 0x4da   :  { %v1549_v41 = vpop.xlane.xlu0 %1548 }
 0x4db   :  { %v1550_v16 = vmul.f32 0.005, %v1549_v41 }
 0x4dc   :  { %v1556_v17 = vpop.xlane.xlu1 %1555 }
 0x4dd   :  { %v1557_v46 = vmul.f32 0.005, %v1556_v17  ;;  %v1558_v18 = vmul.f32 %v1550_v16, %v1550_v16  ;;  %v1561_v23 = vsub.f32 %v1830_v5, %v1550_v16  ;;  %v1562_v24 = vsub.f32 %v1831_v7, %v1550_v16 }
 0x4df   :  { %v1559_v19 = vsub.f32 %v1557_v46, %v1558_v18 }
 0x4e1   :  { %v1560_v20 = vmax.f32 %v1559_v19, 0.0 }
 0x4e3   :  { %v1563_v54 = vadd.f32 1e-05, %v1560_v20 }
 0x4e5   :  { %2042 = vrsqrt.f32 %v1563_v54 }
 0x4ef   :  { %v2043_v27 = vpop.eup %2042 }
 0x4f0   :  { %v1565_v28 = vmul.f32 %v2043_v27, %v1561_v23  ;;  %v1566_v29 = vmul.f32 %v2043_v27, %v1562_v24 }
 0x4f2   :  { %v1578_v36 = vmul.f32 %v1571_v25, %v1565_v28  ;;  %v1579_v37 = vmul.f32 %v1575_v26, %v1566_v29 }
 0x4f4   :  { %v1591_v51 = vadd.f32 %v1584_v33, %v1578_v36  ;;  %v1592_v40 = vadd.f32 %v1588_v34, %v1579_v37 }
 0x4f6   :  { %v1593_v47 = vmax.f32 %v1591_v51, 0.0  ;;  %v1594_v49 = vmax.f32 %v1592_v40, 0.0 }
 0x4f8   :  { %v1608_v50 = vmul.f32 %v1601_v44, %v1593_v47  ;;  %v1609_v52 = vmul.f32 %v1605_v45, %v1594_v49 }
 0x4fa   :  { %v1610_v53 = vsel %vm1545_vm7, %v1609_v52, 0.0 }
 0x4fb   :  { %v1611_v55 = vadd.f32 %v1610_v53, %v1608_v50 }
 0x4fd   :  { %1612 = vadd.xlane.f32.xlu0 %v1611_v55 }
 0x58a   :  { %v1613_v58 = vpop.xlane.xlu0 %1612 }
 0x58b   :  { %v1616_v59 = vadd.f32 %v1615_v57, %v1613_v58 }
 0x58d   :  { %v1621_v31 = vrot.slane %v1616_v59, %v1620_v56 }
 0x58f   :  { %1624 = vst.msk [vmem:[%s2703_s8] sm:$0x1] %vm1623_vm8, %v1621_v31 }

</bundles_post_ra>
